<compile_context>
chip_gen: v6e
topology: v6e:2x2x1
jax: 0.10.0
libtpu: 0.0.40
codegen_flags: <defaults>
</compile_context>

<pallas_src>
import functools

import jax
import jax.numpy as jnp
from jax import lax
from jax.experimental import pallas as pl
from jax.experimental.pallas import tpu as pltpu


def _conv_fuser_kernel(x_ref, t_ref, bias_ref, o_ref, *, H):
    """One row-tile (a whole number of images) per grid step.

    x_ref:    (TM, W*Cin)        lane-dense input rows (bf16), TM = imgs*H
    t_ref:    (W*Cin, 3*W*Cout)  kh-fused block-banded conv weights
                                 (BN scale folded, bf16)
    bias_ref: (1, W*Cout)        folded BN bias per output lane (f32)
    o_ref:    (TM, W*Cout)       fused output rows, lane-dense
    """
    TM, wcout = o_ref.shape

    # One wide MXU matmul; f32 accumulation.
    res = jnp.dot(x_ref[...], t_ref[...],
                  preferred_element_type=jnp.float32)      # (TM, 3*W*Cout)

    # 128-aligned lane slices -> no relayout.
    top = res[:, :wcout]              # kh = 0: input row h -> output row h+1
    mid = res[:, wcout:2 * wcout]     # kh = 1: same row
    bot = res[:, 2 * wcout:]          # kh = 2: input row h -> output row h-1

    # Row shifts on the XLU + boundary masks implementing the H-direction zero
    # padding.  Tiles hold whole images, so the only rows to mask are image
    # boundaries (local row id 0 / H-1); no halo between grid steps is needed.
    local = lax.broadcasted_iota(jnp.int32, (TM, wcout), 0) % H
    top_sh = pltpu.roll(top, shift=1, axis=0)               # row h -> h+1
    bot_sh = pltpu.roll(bot, shift=TM - 1, axis=0)          # row h -> h-1

    acc = mid
    acc = acc + jnp.where(local != 0, top_sh, 0.0)
    acc = acc + jnp.where(local != H - 1, bot_sh, 0.0)

    # Fused BatchNorm bias (scale folded into t_ref) + ReLU.
    o_ref[...] = jnp.maximum(acc + bias_ref[...], 0.0).astype(o_ref.dtype)


def _band_weights(w, W):
    """Build per-kh block-banded weight slabs over the full Cin.

    w: (Cout, Cin, 3, 3) conv weights (PyTorch OIHW layout, BN scale folded).
    Returns T of shape (3, W*Cin, W*Cout) with
      T[kh, wi*Cin + ci, wo*Cout + co] = w[co, ci, kh, wi - wo + 1]
    when 0 <= wi - wo + 1 <= 2 and 0 otherwise (folds the kw taps and the
    width-direction zero padding of the conv into the contraction).
    """
    Cout, Cin = w.shape[0], w.shape[1]
    wk = jnp.transpose(w, (2, 3, 1, 0))                   # (kh, kw, ci, co)
    wi = jnp.arange(W)[:, None]
    wo = jnp.arange(W)[None, :]
    kw = wi - wo + 1                                      # (W, W)
    valid = (kw >= 0) & (kw <= 2)
    kw_c = jnp.clip(kw, 0, 2)
    blocks = wk[:, kw_c]                                  # (3, W, W, Cin, Cout)
    blocks = jnp.where(valid[None, :, :, None, None], blocks, 0.0)
    blocks = jnp.transpose(blocks, (0, 1, 3, 2, 4))       # (3, wi, ci, wo, co)
    return blocks.reshape(3, W * Cin, W * Cout)


def _pick_imgs_per_step(N, H, rows_target=256):
    """Whole images per grid step: aim for ~rows_target rows per matmul while
    keeping >= 2 grid steps when the batch allows it (v7x has 2 TensorCores)."""
    per = max(1, rows_target // max(H, 1))
    if N >= 2:
        per = max(1, min(per, N // 2))
    while N % per != 0:
        per -= 1
    return per


def conv_fuser_forward(img_bev, lidar_bev, conv_w, bn_gamma, bn_beta,
                       bn_mean, bn_var, eps=1e-5, compute_dtype=jnp.bfloat16):
    """img_bev, lidar_bev: NCHW. conv_w: (Cout, Cin, 3, 3) PyTorch layout.
    Returns fused BEV features in NCHW (same semantics as ConvFuser.forward)."""
    N, c_img, H, W = img_bev.shape
    c_lidar = lidar_bev.shape[1]
    Cin = c_img + c_lidar
    Cout = conv_w.shape[0]
    wcin, wcout = W * Cin, W * Cout

    # ---- parameter prep (wrapper-side, tiny): fold BN scale into weights ----
    scale = bn_gamma / jnp.sqrt(bn_var + eps)                        # (Cout,)
    bias = bn_beta - bn_mean * scale                                 # (Cout,)
    w_scaled = conv_w.astype(jnp.float32) * scale[:, None, None, None]

    # Banded per-kh slabs fused along N: (W*Cin, 3*W*Cout).
    t_all = _band_weights(w_scaled, W)                               # (3, WCin, WCout)
    t_cat = jnp.transpose(t_all, (1, 0, 2)).reshape(wcin, 3 * wcout)
    t_cat = t_cat.astype(compute_dtype)
    bias_lane = jnp.tile(bias, W).reshape(1, wcout).astype(jnp.float32)

    # ---- activations: channel concat + NCHW -> lane-dense (N*H, W*Cin) -----
    x = jnp.concatenate([jnp.transpose(img_bev, (0, 2, 3, 1)),
                         jnp.transpose(lidar_bev, (0, 2, 3, 1))], axis=-1)
    x = x.reshape(N * H, wcin).astype(compute_dtype)

    imgs_per_step = _pick_imgs_per_step(N, H)
    tm = imgs_per_step * H                      # rows per grid step
    grid = (N // imgs_per_step,)

    out = pl.pallas_call(
        functools.partial(_conv_fuser_kernel, H=H),
        out_shape=jax.ShapeDtypeStruct((N * H, wcout), img_bev.dtype),
        grid_spec=pltpu.PrefetchScalarGridSpec(
            num_scalar_prefetch=0,
            grid=grid,
            in_specs=[
                pl.BlockSpec((tm, wcin), lambda i: (i, 0)),
                pl.BlockSpec((wcin, 3 * wcout), lambda i: (0, 0)),
                pl.BlockSpec((1, wcout), lambda i: (0, 0)),
            ],
            out_specs=pl.BlockSpec((tm, wcout), lambda i: (i, 0)),
        ),
        compiler_params=pltpu.CompilerParams(
            dimension_semantics=("parallel",),
            # Safe on all generations (v5e default is only ~16 MiB scoped);
            # raise further when scaling row tiles to production BEV sizes.
            vmem_limit_bytes=32 * 1024 * 1024,
        ),
    )(x, t_cat, bias_lane)

    out = out.reshape(N, H, W, Cout)
    return jnp.transpose(out, (0, 3, 1, 2))                          # back to NCHW


def _reference(img_bev, lidar_bev, conv_w, bn_gamma, bn_beta, bn_mean, bn_var,
               eps=1e-5):
    """Pure-JAX f32 reference (NCHW conv + eval BN + ReLU)."""
    cat_bev = jnp.concatenate([img_bev, lidar_bev], axis=1)
    y = lax.conv_general_dilated(
        cat_bev, conv_w, window_strides=(1, 1), padding=((1, 1), (1, 1)),
        dimension_numbers=("NCHW", "OIHW", "NCHW"))
    scale = bn_gamma / jnp.sqrt(bn_var + eps)
    bias = bn_beta - bn_mean * scale
    y = y * scale[None, :, None, None] + bias[None, :, None, None]
    return jnp.maximum(y, 0.0)


if __name__ == "__main__":
    # Small synthetic config: IN_CHANNEL = img_C + lidar_C = 4 + 4 = 8, OUT_CHANNEL = 8.
    N, img_C, lidar_C, H, W = 2, 4, 4, 16, 16
    Cin, Cout = img_C + lidar_C, 8

    key = jax.random.PRNGKey(0)
    k1, k2, k3, k4, k5, k6, k7 = jax.random.split(key, 7)

    img_bev = jax.random.normal(k1, (N, img_C, H, W), jnp.float32)
    lidar_bev = jax.random.normal(k2, (N, lidar_C, H, W), jnp.float32)

    # Deterministic parameter init (synthetic; PyTorch layouts).
    conv_w = 0.1 * jax.random.normal(k3, (Cout, Cin, 3, 3), jnp.float32)
    bn_gamma = 1.0 + 0.05 * jax.random.normal(k4, (Cout,), jnp.float32)
    bn_beta = 0.05 * jax.random.normal(k5, (Cout,), jnp.float32)
    bn_mean = 0.05 * jax.random.normal(k6, (Cout,), jnp.float32)
    bn_var = jnp.abs(1.0 + 0.05 * jax.random.normal(k7, (Cout,), jnp.float32))

    fused = conv_fuser_forward(img_bev, lidar_bev, conv_w,
                               bn_gamma, bn_beta, bn_mean, bn_var)
    fused = jax.block_until_ready(fused)

    ref = _reference(img_bev, lidar_bev, conv_w,
                     bn_gamma, bn_beta, bn_mean, bn_var)
    assert fused.shape == (N, Cout, H, W)
    max_err = float(jnp.max(jnp.abs(fused - ref)))
    # bf16 matmul inputs with f32 accumulation -> loosened tolerance vs f32 ref.
    assert max_err < 5e-2, max_err

    print("KERNEL_OK")
</pallas_src>

<mosaic_0001>
module attributes {stable_mosaic.version = 11 : i64} {
  func.func @_conv_fuser_kernel(%arg0: i32, %arg1: memref<16x128xbf16, #tpu.memory_space<vmem>>, %arg2: memref<128x384xbf16, #tpu.memory_space<vmem>>, %arg3: memref<1x128xf32, #tpu.memory_space<vmem>>, %arg4: memref<16x128xf32, #tpu.memory_space<vmem>>) attributes {dimension_semantics = [#tpu.dimension_semantics<parallel>], iteration_bounds = array<i64: 2>, scalar_prefetch = 0 : i64, scratch_operands = 0 : i64, tpu.core_type = #tpu.core_type<tc>, window_params = [{transform_indices = @transform_0, window_bounds = array<i64: 16, 128>}, {pipeline_mode = #tpu.pipeline_mode<synchronous>, transform_indices = @transform_1, window_bounds = array<i64: 128, 384>}, {pipeline_mode = #tpu.pipeline_mode<synchronous>, transform_indices = @transform_2, window_bounds = array<i64: 1, 128>}, {transform_indices = @transform_3, window_bounds = array<i64: 16, 128>}]} {
    %c0 = arith.constant 0 : index
    %c0_0 = arith.constant 0 : index
    %0 = vector.load %arg1[%c0, %c0_0] : memref<16x128xbf16, #tpu.memory_space<vmem>>, vector<16x128xbf16>
    %c0_1 = arith.constant 0 : index
    %c0_2 = arith.constant 0 : index
    %1 = vector.load %arg2[%c0_1, %c0_2] : memref<128x384xbf16, #tpu.memory_space<vmem>>, vector<128x384xbf16>
    %cst = arith.constant dense<0.000000e+00> : vector<16x384xf32>
    %2 = tpu.matmul %0, %1, %cst {dimension_numbers = #tpu.dot_dimension_numbers<[1], [0], [0], [1], [0, 0, 1, 1], [], []>} : vector<16x128xbf16>, vector<128x384xbf16>, vector<16x384xf32> -> vector<16x384xf32>
    %3 = vector.extract_strided_slice %2 {offsets = [0, 0], sizes = [16, 128], strides = [1, 1]} : vector<16x384xf32> to vector<16x128xf32>
    %4 = vector.extract_strided_slice %2 {offsets = [0, 128], sizes = [16, 128], strides = [1, 1]} : vector<16x384xf32> to vector<16x128xf32>
    %5 = vector.extract_strided_slice %2 {offsets = [0, 256], sizes = [16, 128], strides = [1, 1]} : vector<16x384xf32> to vector<16x128xf32>
    %6 = tpu.iota {dimensions = array<i32: 0>} : vector<16x128xi32>
    %c16_i32 = arith.constant 16 : i32
    %c0_i32 = arith.constant 0 : i32
    %7 = arith.cmpi eq, %c16_i32, %c0_i32 : i32
    %c1_i32 = arith.constant 1 : i32
    %8 = arith.select %7, %c1_i32, %c16_i32 : i32
    %9 = vector.broadcast %8 : i32 to vector<16x128xi32>
    %10 = arith.remsi %6, %9 : vector<16x128xi32>
    %c0_i32_3 = arith.constant 0 : i32
    %11 = vector.broadcast %c0_i32_3 : i32 to vector<16x128xi32>
    %12 = arith.cmpi ne, %10, %11 : vector<16x128xi32>
    %c0_i32_4 = arith.constant 0 : i32
    %13 = vector.broadcast %c0_i32_4 : i32 to vector<16x128xi32>
    %14 = arith.cmpi slt, %10, %13 : vector<16x128xi32>
    %c0_i32_5 = arith.constant 0 : i32
    %15 = arith.cmpi slt, %8, %c0_i32_5 : i32
    %16 = vector.broadcast %15 : i1 to vector<16x128xi1>
    %17 = vector.broadcast %16 : vector<16x128xi1> to vector<16x128xi1>
    %18 = arith.xori %14, %17 : vector<16x128xi1>
    %19 = arith.andi %18, %12 : vector<16x128xi1>
    %20 = vector.broadcast %8 : i32 to vector<16x128xi32>
    %21 = arith.addi %10, %20 : vector<16x128xi32>
    %22 = arith.select %19, %21, %10 : vector<16x128xi1>, vector<16x128xi32>
    %c1_i32_6 = arith.constant 1 : i32
    %23 = tpu.dynamic_rotate %3 by %c1_i32_6 dim 0 : vector<16x128xf32>, i32 -> vector<16x128xf32>
    %c15_i32 = arith.constant 15 : i32
    %24 = tpu.dynamic_rotate %5 by %c15_i32 dim 0 : vector<16x128xf32>, i32 -> vector<16x128xf32>
    %c0_i32_7 = arith.constant 0 : i32
    %25 = vector.broadcast %c0_i32_7 : i32 to vector<16x128xi32>
    %26 = arith.cmpi ne, %22, %25 : vector<16x128xi32>
    %cst_8 = arith.constant 0.000000e+00 : f32
    %27 = vector.broadcast %cst_8 : f32 to vector<16x128xf32>
    %28 = arith.select %26, %23, %27 : vector<16x128xi1>, vector<16x128xf32>
    %29 = arith.addf %4, %28 : vector<16x128xf32>
    %c15_i32_9 = arith.constant 15 : i32
    %30 = vector.broadcast %c15_i32_9 : i32 to vector<16x128xi32>
    %31 = arith.cmpi ne, %22, %30 : vector<16x128xi32>
    %cst_10 = arith.constant 0.000000e+00 : f32
    %32 = vector.broadcast %cst_10 : f32 to vector<16x128xf32>
    %33 = arith.select %31, %24, %32 : vector<16x128xi1>, vector<16x128xf32>
    %34 = arith.addf %29, %33 : vector<16x128xf32>
    %c0_11 = arith.constant 0 : index
    %c0_12 = arith.constant 0 : index
    %35 = vector.load %arg3[%c0_11, %c0_12] : memref<1x128xf32, #tpu.memory_space<vmem>>, vector<1x128xf32>
    %36 = vector.broadcast %35 : vector<1x128xf32> to vector<16x128xf32>
    %37 = arith.addf %34, %36 : vector<16x128xf32>
    %cst_13 = arith.constant 0.000000e+00 : f32
    %38 = vector.broadcast %cst_13 : f32 to vector<16x128xf32>
    %39 = arith.maximumf %37, %38 : vector<16x128xf32>
    %c0_14 = arith.constant 0 : index
    %c0_15 = arith.constant 0 : index
    %40 = vector.load %arg4[%c0_14, %c0_15] : memref<16x128xf32, #tpu.memory_space<vmem>>, vector<16x128xf32>
    tpu.vector_store %arg4[%c0_14, %c0_15], %39 {strides = array<i32>} : memref<16x128xf32, #tpu.memory_space<vmem>>, vector<16x128xf32>,
    return
  }
  func.func @transform_0(%arg0: i32) -> (i32, i32) {
    %c0_i32 = arith.constant 0 : i32
    %c0_i32_0 = arith.constant 0 : i32
    return %arg0, %c0_i32 : i32, i32
  }
  func.func @transform_1(%arg0: i32) -> (i32, i32) {
    %c0_i32 = arith.constant 0 : i32
    %c0_i32_0 = arith.constant 0 : i32
    %c0_i32_1 = arith.constant 0 : i32
    return %c0_i32, %c0_i32_0 : i32, i32
  }
  func.func @transform_2(%arg0: i32) -> (i32, i32) {
    %c0_i32 = arith.constant 0 : i32
    %c0_i32_0 = arith.constant 0 : i32
    %c0_i32_1 = arith.constant 0 : i32
    return %c0_i32, %c0_i32_0 : i32, i32
  }
  func.func @transform_3(%arg0: i32) -> (i32, i32) {
    %c0_i32 = arith.constant 0 : i32
    %c0_i32_0 = arith.constant 0 : i32
    return %arg0, %c0_i32 : i32, i32
  }
}

</mosaic_0001>

<bundles_post_ra>
// kernel: tpu_custom_call.1
= control target key start
LH: loop header
LB: loop body
LE: loop exit
PB: predicated region body
PF: predicated region fallthrough
CT: control target
= control target key end

     0   :  { %8 = vsyncpa [#allocation3], 0  ;;  %s1132_s0 = inlined_call_operand.hbm [shape: bf16[32,128], index: 0, kind: input, shape index: {}]   ;;  %s1133_s1 = inlined_call_operand.hbm [shape: bf16[128,384], index: 1, kind: input, shape index: {}]   ;;  %s1134_s2 = inlined_call_operand.vmem [shape: f32[1,128], index: 2, kind: input, shape index: {}]   ;;  %s1135_s3 = inlined_call_operand.hbm [shape: f32[32,128], index: 3, kind: output, shape index: {}]  }
   0x1   :  { %10 = vsyncpa [#allocation3 + $0x1], 0 }
   0x2   :  { %11 = vsyncpa [#allocation6], 0 }
   0x3   :  { %12 = vsyncpa [#allocation4], 0 }
   0x4   :  { %14 = vsyncpa [#allocation4 + $0x1], 0  ;;  %s946_s12 = smov 0   ;;  %s948_s13 = smov 0  }
   0x5   :  { %s950_s14 = smov 0   ;;  %s952_s15 = smov 0  }
   0x6 LB: > { %s967_s16 = sadd.s32 4294967295, %s912_s15   ;;  %s618_s17 = sadd.s32 4294967294, %s912_s15   ;;  %s912_s15 = sphi %s952_s15, %s1157_s15   ;;  %s908_s14 = sphi %s950_s14, %s1156_s14   ;;  %s904_s13 = sphi %s948_s13, %s1155_s13   ;;  %s900_s12 = sphi %s946_s12, %s1154_s12  }
   0x7   : > { %p40_p0 = scmp.ne.s32.totalorder %s904_s13, %s900_s12  ;;  %p1136_p1 = scmp.eq.s32.totalorder %s967_s16, 0 }
   0x8   : > { %p112_p3 = scmp.eq.s32.totalorder %s618_s17, 1  ;;  %p619_p5 = scmp.ge.s32.totalorder %s912_s15, 1 }
   0x9   : > { %p976_p4 = por %p1136_p1, %p40_p0  ;;  %p119_p7 = scmp.lt.s32.totalorder %s912_s15, 3 }
   0xa   : > { %p981_p6 = por %p112_p3, %p40_p0  ;;  %s914_s21 = smov [#allocation5]  }
   0xb   : > { %s1140_s18 = scalar_select %p976_p4, 1, 0 }
   0xc   : > { %s1141_s19 = scalar_select %p981_p6, 1, 0 }
   0xd   : > { %p986_p8 = pnand %p619_p5, %p119_p7  ;;  %s131_s22 = sshll.u32 %s914_s21, 4  ;;  %s132_s22 = int_to_ptr.vmem [resolvable:$true] %s131_s22 }
   0xe   : > { %s1000_s24 = sadd.s32 1, %s912_s15   ;;  %s27_s25 = sadd.s32 1, %s908_s14 }
   0xf   : > { %s1142_s20 = scalar_select %p986_p8, 1, 0 }
  0x10   : > { %p699_p9 = pneg %p986_p8  ;;  %s24_s26 = ssub.s32 %s912_s15, %s1000_s24 }
  0x11   : > { %s801_s27 = scalar_lea.vmem %s132_s22, 3072  ;;  %p809_p5 = scmp.lt.s32.totalorder %s132_s22, %s132_s22 }
  0x12   : > { %p995_p11 = pnand %p699_p9, %p1136_p1  ;;  %p802_p13 = scmp.ne.s32.totalorder %s132_s22, %s801_s27 }
  0x13   : > { %p810_p7 = scmp.lt.s32.totalorder %s801_s27, %s801_s27 }
  0x14   : > { %p792_p12 = pneg %p995_p11 }
  0x15   : > { %p811_p10 = por %p810_p7, %p809_p5 }
  0x16   : > { %p804_p0 = pnand %p802_p13, %p792_p12 }
  0x18   : > { %p805_p3 = pneg %p804_p0 }
  0x1a   : > { %p812_p2 = pnand %p811_p10, %p805_p3 }
  0x1c   : > { %815 = shalt.err (!%p812_p2)
}
  0x1d   : > { %s915_s28 = smov 192   ;;  %s916_s29 = smov 12  }
  0x1e   : > { %702 = dma.hbm_to_vmem [thread:$0]  (!%p995_p11), %s1133_s1, 3072, %s132_s22, [#allocation6], %s915_s28, %s915_s28, %s916_s29  }
  0x1f   : > { %p25_p9 = scmp.eq.s32.totalorder %s24_s26, 0  ;;  %p34_p12 = scmp.ne.s32.totalorder %s908_s14, %s904_s13 }
  0x20   : > { %p35_p10 = scmp.eq.s32.totalorder %s912_s15, 0  ;;  %p712_p2 = scmp.lt.s32.totalorder %s912_s15, 2 }
  0x21   : > { %s1017_s5 = scalar_select %p25_p9, %s908_s14, %s27_s25  }
  0x22   : > { %p36_p13 = por %p35_p10, %p34_p12  ;;  %p1144_p0 = scmp.eq.s32.totalorder %s967_s16, 1 }
  0x23   : > { %s148_s7 = sand.u32 1, %s908_s14   ;;  %s660_s8 = sshll.u32 %s912_s15, 7 }
  0x24   : > { %p1021_p3 = por %p1144_p0, %p34_p12  ;;  %s622_s9 = sshll.u32 %s148_s7, 3 }
  0x25   : > { %s1030_s17 = scalar_lea.hbm %s1132_s0, %s660_s8  ;;  %s152_s21 = scalar_lea.vmem [#allocation2], %s622_s9 }
  0x26   : > { %s1145_s6 = scalar_select %p1021_p3, 1, 0 }
  0x27   : > { %s159_s22 = sshll.u32 %s152_s21, 4  ;;  %p1032_p11 = pnand %p712_p2, %p36_p13  ;;  %s1036_s22 = int_to_ptr.vmem [resolvable:$true] %s159_s22 }
  0x28   : > { %s1038_s25 = scalar_lea.sflag [#allocation3], %s148_s7  ;;  %s816_s26 = scalar_lea.hbm %s1030_s17, 128 }
  0x29   : > { %p817_p5 = scmp.ne.s32.totalorder %s1030_s17, %s816_s26  ;;  %p818_p7 = pneg %p1032_p11 }
  0x2a   : > { %s821_s29 = scalar_lea.hbm %s1132_s0, 256  ;;  %p822_p10 = scmp.lt.s32.totalorder %s1030_s17, %s1132_s0 }
  0x2b   : > { %p819_p9 = pnand %p818_p7, %p817_p5  ;;  %p823_p2 = scmp.lt.s32.totalorder %s821_s29, %s816_s26 }
  0x2d   : > { %p820_p12 = pneg %p819_p9  ;;  %p824_p13 = por %p823_p2, %p822_p10 }
  0x2f   : > { %p825_p0 = pnand %p824_p13, %p820_p12 }
  0x31   : > { %828 = shalt.err (!%p825_p0)
}
  0x32   : > { %s829_s7 = scalar_lea.vmem %s1036_s22, 128  ;;  %s917_s8 = smov [#allocation2]  }
  0x33   : > { %p830_p1 = scmp.ne.s32.totalorder %s1036_s22, %s829_s7  ;;  %s834_s9 = sshll.u32 %s917_s8, 4  ;;  %s835_s9 = int_to_ptr.vmem [resolvable:$false] %s834_s9 }
  0x34   : > { %s836_s10 = scalar_lea.vmem %s835_s9, 256  ;;  %p837_p9 = scmp.lt.s32.totalorder %s1036_s22, %s835_s9 }
  0x35   : > { %p832_p6 = pnand %p830_p1, %p818_p7  ;;  %p838_p3 = scmp.lt.s32.totalorder %s836_s10, %s829_s7 }
  0x37   : > { %p833_p5 = pneg %p832_p6  ;;  %p839_p4 = por %p838_p3, %p837_p9 }
  0x39   : > { %p840_p8 = pnand %p839_p4, %p833_p5 }
  0x3b   : > { %843 = shalt.err (!%p840_p8)
}
  0x3c   : > { %s918_s11 = smov 64   ;;  %s919_s21 = smov 4  }
  0x3d   : > { %706 = dma.hbm_to_vmem [thread:$0]  (!%p1032_p11), %s1030_s17, 128, %s1036_s22, %s1038_s25, %s918_s11, %s918_s11, %s919_s21  }
  0x3e   : > { %p1147_p1 = scmp.ne.s32.totalorder %s1142_s20, 0 }
  0x3f   : > { %s1062_s26 = sand.u32 (!%p1147_p1), 1, %s904_s13   ;;  %p1148_p4 = scmp.ne.s32.totalorder (!%p1147_p1), %s1140_s18, 0 }
  0x40   : > { %171 = sbr.rel (%p1147_p1) target bundleno = 330 (0x14a), region = 32  ;;  %s626_s27 = sshll.u32 (!%p1147_p1), %s1062_s26, 3 }
  0x41   : > { %s174_s28 = scalar_lea.sflag (!%p1147_p1), [#allocation3], %s1062_s26  ;;  %s1066_s29 = scalar_lea.vmem (!%p1147_p1), [#allocation2], %s626_s27 }
  0x45   : > { %887 = dma.done.wait (%p1148_p4), %s174_s28, 128  }
  0x46   : > { %889 = vsyncadd (%p1148_p4), %s174_s28, 4294967168  ;;  %p1149_p6 = scmp.eq.s32.totalorder %s967_s16, 0 }
  0x48   : > { %891 = dma.done.wait (%p1149_p6), [#allocation6], 3072   ;;  %p1150_p8 = pmov %p1149_p6 }
  0x49   : > { %v920_v0 = vmov 0.0   ;;  %vm921_vm0 = vmmov 0   ;;  %v922_v1 = vmov 0   ;;  %v757_v2 = vld [vmem:[#allocation5 + $0xac] ss:$12 sps:$4 sm:$0xff]   ;;  %v459_v27 = vlaneseq  ;;  %s628_s18 = sshll.u32 %s1062_s26, 4 }
  0x4a   : > { %893 = vsyncadd (%p1150_p8), [#allocation6], 4294964224  ;;  %671 = vmatprep.subr.bf16.mxu1 %v920_v0  ;;  %687 = vmatprep.mubr.msk.bf16.mxu1 %vm921_vm0, %v920_v0  ;;  %v759_v3 = vld [vmem:[#allocation5 + $0xb0] ss:$12 sps:$4 sm:$0xff]   ;;  %v760_v4 = vld [vmem:[#allocation5 + $0xa8] ss:$12 sps:$4 sm:$0xff]  }
  0x4b   : > { %407 = vmatprep.mubr.bf16.mxu0 %v922_v1  ;;  %375 = vmatprep.subr.bf16.mxu0 %v757_v2  ;;  %v761_v5 = vld [vmem:[#allocation5 + $0x94] ss:$12 sps:$4 sm:$0xff]   ;;  %v763_v6 = vld [vmem:[#allocation5 + $0x98] ss:$12 sps:$4 sm:$0xff]   ;;  %v764_v7 = vld [vmem:[#allocation5 + $0x90] ss:$12 sps:$4 sm:$0xff]  }
  0x4c   : > { %672 = vmatpush3.bf16.msra.mxu1 %v759_v3  ;;  %376 = vmatpush1.bf16.msra.mxu0 %v760_v4  ;;  %v765_v8 = vld [vmem:[#allocation5 + $0x7c] ss:$12 sps:$4 sm:$0xff]   ;;  %v767_v9 = vld [vmem:[#allocation5 + $0x80] ss:$12 sps:$4 sm:$0xff]   ;;  %v768_v10 = vld [vmem:[#allocation5 + $0x78] ss:$12 sps:$4 sm:$0xff]  }
  0x4d   : > { %673 = vmatprep.subr.bf16.mxu1 %v920_v0  ;;  %377 = vmatprep.subr.bf16.mxu0 %v761_v5  ;;  %v769_v11 = vld [vmem:[#allocation5 + $0x64] ss:$12 sps:$4 sm:$0xff]   ;;  %v771_v12 = vld [vmem:[#allocation5 + $0x68] ss:$12 sps:$4 sm:$0xff]   ;;  %v772_v13 = vld [vmem:[#allocation5 + $0x60] ss:$12 sps:$4 sm:$0xff]  }
  0x4e   : > { %v773_v14 = vld [vmem:[#allocation5 + $0x4c] ss:$12 sps:$4 sm:$0xff]   ;;  %v775_v15 = vld [vmem:[#allocation5 + $0x50] ss:$12 sps:$4 sm:$0xff]   ;;  %v776_v16 = vld [vmem:[#allocation5 + $0x48] ss:$12 sps:$4 sm:$0xff]  }
  0x4f   : > { %v777_v17 = vld [vmem:[#allocation5 + $0x34] ss:$12 sps:$4 sm:$0xff]   ;;  %v779_v18 = vld [vmem:[#allocation5 + $0x38] ss:$12 sps:$4 sm:$0xff]   ;;  %v780_v19 = vld [vmem:[#allocation5 + $0x30] ss:$12 sps:$4 sm:$0xff]  }
  0x50   : > { %674 = vmatpush3.bf16.msra.mxu1 %v763_v6  ;;  %378 = vmatpush1.bf16.msra.mxu0 %v764_v7  ;;  %v781_v20 = vld [vmem:[#allocation5 + $0x1c] ss:$12 sps:$4 sm:$0xff]   ;;  %v783_v21 = vld [vmem:[#allocation5 + $0x20] ss:$12 sps:$4 sm:$0xff]   ;;  %v784_v22 = vld [vmem:[#allocation5 + $0x18] ss:$12 sps:$4 sm:$0xff]  }
  0x51   : > { %675 = vmatprep.subr.bf16.mxu1 %v920_v0  ;;  %379 = vmatprep.subr.bf16.mxu0 %v765_v8  ;;  %v785_v23 = vld [vmem:[#allocation5 + $0x4] ss:$12 sps:$4 sm:$0xff]   ;;  %v787_v24 = vld [vmem:[#allocation5 + $0x8] ss:$12 sps:$4 sm:$0xff]   ;;  %v788_v25 = vld [vmem:[#allocation5] ss:$12 sps:$4 sm:$0xff]  }
  0x52   : > { %v789_v26 = vld [vmem:[%s1066_s29] sm:$0xff]   ;;  %v460_v28 = vshrl.u32 %v459_v27, 7  ;;  %s203_s22 = scalar_lea.vmem [#allocation7], %s628_s18  ;;  %s661_s25 = sshll.u32 %s967_s16, 8 }
  0x53   : > { %v654_v51 = vld [vmem:[%s1134_s2] ss:$0 sm:$0xff]  ;;  %s535_s23 = sshll.u32 %s203_s22, 4  ;;  %s1089_s7 = scalar_lea.hbm %s1135_s3, %s661_s25  ;;  %s1084_s23 = int_to_ptr.vmem [resolvable:$true] %s535_s23 }
  0x54   : > { %676 = vmatpush3.bf16.msra.mxu1 %v767_v9  ;;  %380 = vmatpush1.bf16.msra.mxu0 %v768_v10  ;;  %v461_v29 = vadd.s32 8, %v460_v28  ;;  %v466_v33 = vand.u32 15, %v460_v28  ;;  %vm493_vm1 = vcmp.lt.s32.totalorder %v460_v28, 7  ;;  %vm488_vm2 = vcmp.lt.s32.totalorder %v460_v28, 1  ;;  %s522_s8 = scalar_lea.sflag [#allocation4], %s1062_s26  ;;  %s844_s9 = scalar_lea.vmem %s1084_s23, 256 }
  0x55   : > { %677 = vmatprep.subr.bf16.mxu1 %v920_v0  ;;  %381 = vmatprep.subr.bf16.mxu0 %v769_v11  ;;  %p845_p3 = scmp.ne.s32.totalorder %s1084_s23, %s844_s9  ;;  %p1151_p11 = scmp.ne.s32.totalorder %s1145_s6, 0 }
  0x56   : > { %v473_v36 = vand.u32 15, %v461_v29  ;;  %vm496_vm3 = vcmp.ne.s32.totalorder %v466_v33, 0  ;;  %s923_s16 = smov [#allocation7]  }
  0x57   : > { %p846_p7 = pnand %p845_p3, %p1151_p11  ;;  %s848_s10 = sshll.u32 %s923_s16, 4  ;;  %s849_s10 = int_to_ptr.vmem [resolvable:$false] %s848_s10 }
  0x58   : > { %678 = vmatpush3.bf16.msra.mxu1 %v771_v12  ;;  %382 = vmatpush1.bf16.msra.mxu0 %v772_v13  ;;  %vm503_vm4 = vcmp.ne.s32.totalorder %v473_v36, 15  ;;  %s850_s11 = scalar_lea.vmem %s849_s10, 512  ;;  %p851_p10 = scmp.lt.s32.totalorder %s1084_s23, %s849_s10 }
  0x59   : > { %679 = vmatprep.subr.bf16.mxu1 %v920_v0  ;;  %383 = vmatprep.subr.bf16.mxu0 %v773_v14  ;;  %p847_p12 = pneg %p846_p7  ;;  %p852_p2 = scmp.lt.s32.totalorder %s850_s11, %s844_s9 }
  0x5b   : > { %p853_p13 = por %p852_p2, %p851_p10 }
  0x5c   : > { %680 = vmatpush3.bf16.msra.mxu1 %v775_v15  ;;  %384 = vmatpush1.bf16.msra.mxu0 %v776_v16 }
  0x5d   : > { %681 = vmatprep.subr.bf16.mxu1 %v920_v0  ;;  %385 = vmatprep.subr.bf16.mxu0 %v777_v17  ;;  %p854_p0 = pnand %p853_p13, %p847_p12 }
  0x60   : > { %682 = vmatpush3.bf16.msra.mxu1 %v779_v18  ;;  %386 = vmatpush1.bf16.msra.mxu0 %v780_v19 }
  0x61   : > { %683 = vmatprep.subr.bf16.mxu1 %v920_v0  ;;  %387 = vmatprep.subr.bf16.mxu0 %v781_v20 }
  0x64   : > { %684 = vmatpush3.bf16.msra.mxu1 %v783_v21  ;;  %388 = vmatpush1.bf16.msra.mxu0 %v784_v22 }
  0x65   : > { %685 = vmatprep.subr.bf16.mxu1 %v920_v0  ;;  %389 = vmatprep.subr.bf16.mxu0 %v785_v23 }
  0x68   : > { %686 = vmatpush3.bf16.msra.mxu1 %v787_v24  ;;  %390 = vmatpush1.bf16.msra.mxu0 %v788_v25 }
  0x6b   : > { %688 = vmatmul.mubr.bf16.vlgmr.msra.gmra.mxu1 %v789_v26  ;;  %408 = vmatmul.mubr.bf16.vlgmr.msra.gmra.mxu0 %v789_v26 }
 0x12b   : > { %v452_v30 = vpop.f32.mrf.mxu1  ;;  %v409_v31 = vpop.f32.mrf.mxu0 }
 0x12c   : > { %v491_v34 = vrot.slane %v452_v30, 1  ;;  %v486_v40 = vrot.slane %v409_v31, 7 }
 0x12d   : > { %v689_v32 = vpop.f32.mrf.mxu1  ;;  %v411_v35 = vpop.f32.mrf.mxu0 }
 0x12f   : > { %v455_v37 = vpop.f32.mrf.mxu1  ;;  %v413_v39 = vpop.f32.mrf.mxu0 }
 0x130   : > { %v492_v38 = vrot.slane %v455_v37, 1  ;;  %v487_v41 = vrot.slane %v413_v39, 7 }
 0x131   : > { %v690_v42 = vpop.f32.mrf.mxu1  ;;  %v415_v43 = vpop.f32.mrf.mxu0 }
 0x132   : > { %v495_v44 = vsel %vm493_vm1, %v492_v38, %v491_v34  ;;  %v489_v45 = vsel %vm488_vm2, %v486_v40, %v487_v41  ;;  %v490_v46 = vsel %vm488_vm2, %v487_v41, %v486_v40  ;;  %v494_v52 = vsel %vm493_vm1, %v491_v34, %v492_v38 }
 0x133   : > { %v498_v47 = vsel %vm496_vm3, %v490_v46, 0.0  ;;  %v501_v48 = vadd.f32 %v489_v45, %v415_v43  ;;  %v505_v50 = vsel %vm503_vm4, %v495_v44, 0.0 }
 0x134   : > { %v500_v49 = vadd.f32 %v498_v47, %v411_v35 }
 0x135   : > { %v507_v53 = vadd.f32 %v505_v50, %v501_v48 }
 0x136   : > { %v506_v54 = vadd.f32 %v500_v49, %v494_v52 }
 0x137   : > { %v516_v55 = vadd.f32 %v654_v51, %v507_v53 }
 0x138   : > { %v515_v56 = vadd.f32 %v654_v51, %v506_v54 }
 0x139   : > { %v518_v57 = vmax.f32 %v516_v55, 0.0 }
 0x13a   : > { %v517_v58 = vmax.f32 %v515_v56, 0.0 }
 0x13b   : > { %520 = vst [vmem:[%s203_s22 + $0x8] sm:$0xff] %v518_v57 }
 0x13c   : > { %519 = vst [vmem:[%s203_s22] sm:$0xff] %v517_v58 }
 0x13d   : > { %857 = shalt.err (!%p854_p0)
}
 0x13e   : > { %s858_s21 = scalar_lea.hbm %s1089_s7, 256  ;;  %s862_s29 = scalar_lea.hbm %s1135_s3, 512 }
 0x13f   : > { %p859_p5 = scmp.ne.s32.totalorder %s1089_s7, %s858_s21  ;;  %p863_p4 = scmp.lt.s32.totalorder %s1089_s7, %s1135_s3 }
 0x140   : > { %p864_p6 = scmp.lt.s32.totalorder %s862_s29, %s858_s21 }
 0x141   : > { %p860_p9 = pnand %p859_p5, %p1151_p11 }
 0x142   : > { %p865_p8 = por %p864_p6, %p863_p4 }
 0x143   : > { %p861_p1 = pneg %p860_p9 }
 0x145   : > { %p866_p3 = pnand %p865_p8, %p861_p1 }
 0x147   : > { %869 = shalt.err (!%p866_p3)
}
 0x148   : > { %s924_s17 = smov 128   ;;  %s925_s22 = smov 8  }
 0x149   : > { %697 = dma.vmem_to_hbm [thread:$0]  (%p1151_p11), %s1084_s23, 256, %s1089_s7, %s522_s8, %s924_s17, %s924_s17, %s925_s22  }
 0x14a PF: > { %s550_s25 = sand.u32 1, %s900_s12   ;;  %p1152_p7 = scmp.ne.s32.totalorder %s1141_s19, 0 }
 0x14b   : > { %p1153_p12 = scmp.ge.s32.totalorder %s912_s15, 2  ;;  %s551_s30 = scalar_lea.sflag [#allocation4], %s550_s25 }
 0x14d   : > { %p708_p10 = pnand %p1153_p12, %p1152_p7 }
 0x14f   : > { %p709_p2 = pneg %p708_p10 }
 0x151   : > { %895 = dma.done.wait (%p709_p2), %s551_s30, 256  }
 0x152   : > { %897 = vsyncadd (%p709_p2), %s551_s30, 4294967040  ;;  %p17_p13 = scmp.ge.s32.totalorder %s1000_s24, 4   ;;  %s1154_s12 = smov %s904_s13 }
 0x153   : > { %s1155_s13 = smov %s908_s14  ;;  %s1156_s14 = smov %s1017_s5 }
 0x154   : > { %s1157_s15 = smov %s1000_s24  ;;  %19 = sbr.rel (!%p17_p13) target bundleno = 6 (0x6), region = 81 }
 0x159   :  { %556 = vsyncpa [#allocation3], 1 }
 0x15a   :  { %558 = vsyncpa [#allocation3 + $0x1], 1 }
 0x15b   :  { %559 = vsyncpa [#allocation6], 1 }
 0x15c   :  { %560 = vsyncpa [#allocation4], 1 }
 0x15d   :  { %562 = vsyncpa [#allocation4 + $0x1], 1 }

</bundles_post_ra>
